<compile_context>
chip_gen: v6e
topology: v6e:2x2x1
jax: 0.10.0
libtpu: 0.0.40
codegen_flags: <defaults>
</compile_context>

<pallas_src>
import jax
import jax.numpy as jnp
from jax.experimental import pallas as pl
from jax.experimental.pallas import tpu as pltpu

HIDDEN = 480  # fixed by the module definition


def _round_up(x, m):
    return ((x + m - 1) // m) * m


def _confidence_kernel(x_ref, w1_ref, w2_ref, b2_ref, o_ref):
    # x_ref:  (Cin+1, TM)        pixels on the lane axis; last channel == 1.0
    # w1_ref: (HIDDEN, Cin+1)    [conv1 weight | conv1 bias]  (resident)
    # w2_ref: (Cout, HIDDEN)     conv2 weight                 (resident)
    # b2_ref: (Cout, 1)          conv2 bias
    # o_ref:  (Cout, TM)
    #
    # Layer 1 (+bias, folded into K) on the MXU -> hidden tile written once.
    h = jnp.dot(w1_ref[...], x_ref[...], preferred_element_type=jnp.float32)
    # Single elementwise pass over the hidden tile.
    h = jnp.maximum(h, 0.0)
    # Layer 2 on the MXU; bias add on the small (Cout, TM) output is cheap.
    y = jnp.dot(w2_ref[...], h, preferred_element_type=jnp.float32) + b2_ref[...]
    o_ref[...] = y.astype(o_ref.dtype)


def confidence_stage(x_nchw, w1, b1, w2, b2, *, tile_m=2048):
    """Forward pass of ConfidenceStage.

    Args:
      x_nchw: (N, Cin, H, W) float32
      w1: (480, Cin, 1, 1)  conv1 weight (PyTorch layout)
      b1: (480,)            conv1 bias
      w2: (Cout, 480, 1, 1) conv2 weight (PyTorch layout)
      b2: (Cout,)           conv2 bias
      tile_m: target pixels per grid step.  The actual tile is a multiple of
        128 chosen so the image splits into equal tiles with minimal padding.
    Returns:
      (N, Cout, H, W) float32
    """
    N, Cin, H, W = x_nchw.shape
    hidden = w1.shape[0]
    Cout = w2.shape[0]
    HW = H * W

    # Balanced lane-aligned pixel tiling: pad HW only up to the next multiple
    # of 128 * n_tiles (not up to a fixed large tile).
    hw128 = _round_up(HW, 128)
    tile_target = _round_up(max(128, tile_m), 128)
    n_tiles = pl.cdiv(hw128, tile_target)
    tile_m = _round_up(pl.cdiv(hw128, n_tiles), 128)
    HW_pad = tile_m * n_tiles

    # NCHW is already (channels, pixels) per image: free reshape.  Append an
    # all-ones channel so conv1's bias rides the MXU contraction (saves one
    # read+write pass over the 480-row hidden tile), and pad the pixel axis
    # to the tile boundary (padded columns are sliced off at the end).
    x_m = x_nchw.reshape(N, Cin, HW)
    x_aug = jnp.pad(x_m, ((0, 0), (0, 1), (0, HW_pad - HW)), constant_values=1.0)

    # PyTorch (O, I) weight orientation already matches Y = W @ X.
    w1_aug = jnp.concatenate(
        [w1.reshape(hidden, Cin), b1.reshape(hidden, 1)], axis=1)   # (480, Cin+1)
    w2_mat = w2.reshape(Cout, hidden)                               # (Cout, 480)
    b2_col = b2.reshape(Cout, 1)

    grid = (N, n_tiles)

    flops = 2 * N * HW_pad * hidden * (Cin + 1 + Cout)
    bytes_accessed = 4 * (N * HW_pad * (Cin + 1 + Cout)
                          + hidden * (Cin + 1) + Cout * (hidden + 1))

    out_m = pl.pallas_call(
        _confidence_kernel,
        out_shape=jax.ShapeDtypeStruct((N, Cout, HW_pad), x_nchw.dtype),
        grid_spec=pltpu.PrefetchScalarGridSpec(
            num_scalar_prefetch=0,
            grid=grid,
            in_specs=[
                pl.BlockSpec((None, Cin + 1, tile_m), lambda n, i: (n, 0, i)),  # x tile
                pl.BlockSpec((hidden, Cin + 1), lambda n, i: (0, 0)),           # w1|b1 (resident)
                pl.BlockSpec((Cout, hidden), lambda n, i: (0, 0)),              # w2 (resident)
                pl.BlockSpec((Cout, 1), lambda n, i: (0, 0)),                   # b2
            ],
            out_specs=pl.BlockSpec((None, Cout, tile_m), lambda n, i: (n, 0, i)),
        ),
        compiler_params=pltpu.CompilerParams(
            dimension_semantics=("parallel", "parallel"),
            vmem_limit_bytes=32 * 1024 * 1024,
        ),
        cost_estimate=pl.CostEstimate(
            flops=flops, transcendentals=0, bytes_accessed=bytes_accessed),
    )(x_aug, w1_aug, w2_mat, b2_col)

    return out_m[:, :, :HW].reshape(N, Cout, H, W)


def _reference(x_nchw, w1, b1, w2, b2):
    """Pure-JAX high-precision reference of the PyTorch forward."""
    N, Cin, H, W = x_nchw.shape
    hidden = w1.shape[0]
    Cout = w2.shape[0]
    xm = x_nchw.reshape(N, Cin, H * W)
    hp = jax.lax.Precision.HIGHEST
    h = jnp.einsum("oc,ncm->nom", w1.reshape(hidden, Cin), xm, precision=hp)
    h = jnp.maximum(h + b1[None, :, None], 0.0)
    y = jnp.einsum("oc,ncm->nom", w2.reshape(Cout, hidden), h, precision=hp)
    y = y + b2[None, :, None]
    return y.reshape(N, Cout, H, W)


if __name__ == "__main__":
    key = jax.random.PRNGKey(0)
    k_x, k_w1, k_b1, k_w2, k_b2 = jax.random.split(key, 5)

    # Small shapes consistent with the module: input_shape=4, output_shape=8.
    N, Cin, H, W = 2, 4, 16, 16
    Cout = 8

    x = jax.random.normal(k_x, (N, Cin, H, W), dtype=jnp.float32)

    # Deterministic synthetic parameters (PyTorch conv weight layout: O, I, 1, 1).
    w1 = 0.05 * jax.random.normal(k_w1, (HIDDEN, Cin, 1, 1), dtype=jnp.float32)
    b1 = 0.05 * jax.random.normal(k_b1, (HIDDEN,), dtype=jnp.float32)
    w2 = 0.05 * jax.random.normal(k_w2, (Cout, HIDDEN, 1, 1), dtype=jnp.float32)
    b2 = 0.05 * jax.random.normal(k_b2, (Cout,), dtype=jnp.float32)

    out = confidence_stage(x, w1, b1, w2, b2)
    out = jax.block_until_ready(out)

    ref = _reference(x, w1, b1, w2, b2)
    assert out.shape == (N, Cout, H, W), out.shape
    # Both layers use default MXU precision (bf16 multiply passes, f32
    # accumulation); tolerate that rounding vs the HIGHEST-precision reference.
    assert jnp.allclose(out, ref, atol=3e-3, rtol=3e-3), (
        float(jnp.max(jnp.abs(out - ref))))

    print("KERNEL_OK")
</pallas_src>

<mosaic_0001>
module attributes {stable_mosaic.version = 11 : i64} {
  func.func @_confidence_kernel(%arg0: i32, %arg1: i32, %arg2: memref<1x5x256xf32, #tpu.memory_space<vmem>>, %arg3: memref<480x5xf32, #tpu.memory_space<vmem>>, %arg4: memref<8x480xf32, #tpu.memory_space<vmem>>, %arg5: memref<8x1xf32, #tpu.memory_space<vmem>>, %arg6: memref<1x8x256xf32, #tpu.memory_space<vmem>>) attributes {dimension_semantics = [#tpu.dimension_semantics<parallel>, #tpu.dimension_semantics<parallel>], iteration_bounds = array<i64: 2, 1>, scalar_prefetch = 0 : i64, scratch_operands = 0 : i64, tpu.core_type = #tpu.core_type<tc>, window_params = [{transform_indices = @transform_0, window_bounds = array<i64: 1, 5, 256>}, {pipeline_mode = #tpu.pipeline_mode<synchronous>, transform_indices = @transform_1, window_bounds = array<i64: 480, 5>}, {pipeline_mode = #tpu.pipeline_mode<synchronous>, transform_indices = @transform_2, window_bounds = array<i64: 8, 480>}, {pipeline_mode = #tpu.pipeline_mode<synchronous>, transform_indices = @transform_3, window_bounds = array<i64: 8, 1>}, {transform_indices = @transform_4, window_bounds = array<i64: 1, 8, 256>}]} {
    %c0 = arith.constant 0 : index
    %c0_0 = arith.constant 0 : index
    %0 = vector.load %arg3[%c0, %c0_0] : memref<480x5xf32, #tpu.memory_space<vmem>>, vector<480x5xf32>
    %c0_1 = arith.constant 0 : index
    %c0_2 = arith.constant 0 : index
    %c0_3 = arith.constant 0 : index
    %1 = vector.load %arg2[%c0_1, %c0_2, %c0_3] : memref<1x5x256xf32, #tpu.memory_space<vmem>>, vector<1x5x256xf32>
    %2 = vector.shape_cast %1 : vector<1x5x256xf32> to vector<5x256xf32>
    %cst = arith.constant dense<0.000000e+00> : vector<480x256xf32>
    %3 = tpu.matmul %0, %2, %cst {dimension_numbers = #tpu.dot_dimension_numbers<[1], [0], [0], [1], [0, 0, 1, 1], [], []>} : vector<480x5xf32>, vector<5x256xf32>, vector<480x256xf32> -> vector<480x256xf32>
    %cst_4 = arith.constant 0.000000e+00 : f32
    %4 = vector.broadcast %cst_4 : f32 to vector<480x256xf32>
    %5 = arith.maximumf %3, %4 : vector<480x256xf32>
    %c0_5 = arith.constant 0 : index
    %c0_6 = arith.constant 0 : index
    %6 = vector.load %arg4[%c0_5, %c0_6] : memref<8x480xf32, #tpu.memory_space<vmem>>, vector<8x480xf32>
    %cst_7 = arith.constant dense<0.000000e+00> : vector<8x256xf32>
    %7 = tpu.matmul %6, %5, %cst_7 {dimension_numbers = #tpu.dot_dimension_numbers<[1], [0], [0], [1], [0, 0, 1, 1], [], []>} : vector<8x480xf32>, vector<480x256xf32>, vector<8x256xf32> -> vector<8x256xf32>
    %c0_8 = arith.constant 0 : index
    %c0_9 = arith.constant 0 : index
    %8 = vector.load %arg5[%c0_8, %c0_9] : memref<8x1xf32, #tpu.memory_space<vmem>>, vector<8x1xf32>
    %9 = vector.broadcast %8 : vector<8x1xf32> to vector<8x256xf32>
    %10 = arith.addf %7, %9 : vector<8x256xf32>
    %c0_10 = arith.constant 0 : index
    %c0_11 = arith.constant 0 : index
    %c0_12 = arith.constant 0 : index
    %11 = vector.load %arg6[%c0_10, %c0_11, %c0_12] : memref<1x8x256xf32, #tpu.memory_space<vmem>>, vector<1x8x256xf32>
    %12 = vector.shape_cast %11 : vector<1x8x256xf32> to vector<8x256xf32>
    %13 = vector.shape_cast %10 : vector<8x256xf32> to vector<1x8x256xf32>
    tpu.vector_store %arg6[%c0_10, %c0_11, %c0_12], %13 {strides = array<i32>} : memref<1x8x256xf32, #tpu.memory_space<vmem>>, vector<1x8x256xf32>,
    return
  }
  func.func @transform_0(%arg0: i32, %arg1: i32) -> (i32, i32, i32) {
    %c0_i32 = arith.constant 0 : i32
    %c0_i32_0 = arith.constant 0 : i32
    return %arg0, %c0_i32, %arg1 : i32, i32, i32
  }
  func.func @transform_1(%arg0: i32, %arg1: i32) -> (i32, i32) {
    %c0_i32 = arith.constant 0 : i32
    %c0_i32_0 = arith.constant 0 : i32
    %c0_i32_1 = arith.constant 0 : i32
    return %c0_i32, %c0_i32_0 : i32, i32
  }
  func.func @transform_2(%arg0: i32, %arg1: i32) -> (i32, i32) {
    %c0_i32 = arith.constant 0 : i32
    %c0_i32_0 = arith.constant 0 : i32
    %c0_i32_1 = arith.constant 0 : i32
    return %c0_i32, %c0_i32_0 : i32, i32
  }
  func.func @transform_3(%arg0: i32, %arg1: i32) -> (i32, i32) {
    %c0_i32 = arith.constant 0 : i32
    %c0_i32_0 = arith.constant 0 : i32
    %c0_i32_1 = arith.constant 0 : i32
    return %c0_i32, %c0_i32_0 : i32, i32
  }
  func.func @transform_4(%arg0: i32, %arg1: i32) -> (i32, i32, i32) {
    %c0_i32 = arith.constant 0 : i32
    %c0_i32_0 = arith.constant 0 : i32
    return %arg0, %c0_i32, %arg1 : i32, i32, i32
  }
}

</mosaic_0001>

<bundles_post_ra>
// kernel: tpu_custom_call.1
= control target key start
LH: loop header
LB: loop body
LE: loop exit
PB: predicated region body
PF: predicated region fallthrough
CT: control target
= control target key end

     0   :  { %9 = vsyncpa [#allocation3], 0  ;;  %s2177_s0 = inlined_call_operand.vmem [shape: f32[2,5,256], index: 0, kind: input, shape index: {}]   ;;  %s2178_s1 = inlined_call_operand.vmem [shape: f32[480,5], index: 1, kind: input, shape index: {}]   ;;  %s2179_s2 = inlined_call_operand.vmem [shape: f32[8,480], index: 2, kind: input, shape index: {}]   ;;  %s2180_s3 = inlined_call_operand.vmem [shape: f32[8,1], index: 3, kind: input, shape index: {}]   ;;  %s2181_s4 = inlined_call_operand.hbm [shape: f32[2,8,256], index: 4, kind: output, shape index: {}]  }
   0x1   :  { %11 = vsyncpa [#allocation3 + $0x1], 0  ;;  %s1517_s15 = smov 0   ;;  %s1519_s16 = smov 0  }
   0x2   :  { %s1521_s17 = smov 0   ;;  %s1523_s18 = smov 0  }
   0x3   :  { %s1525_s19 = smov 0   ;;  %s1527_s20 = smov 0  }
   0x4 LB: > { %s1273_s21 = sadd.s32 4294967295, %s1487_s20   ;;  %s1274_s22 = sadd.s32 4294967294, %s1487_s20   ;;  %s1487_s20 = sphi %s1527_s20, %s17_s20   ;;  %s1483_s19 = sphi %s1525_s19, %s2202_s19   ;;  %s1479_s18 = sphi %s1523_s18, %s2201_s18   ;;  %s1475_s17 = sphi %s1521_s17, %s2200_s17   ;;  %s1471_s16 = sphi %s1519_s16, %s2199_s16   ;;  %s1467_s15 = sphi %s1517_s15, %s2198_s15  }
   0x5   : > { %s29_s23 = sadd.s32 1, %s1483_s19  ;;  %s129_s24 = sadd.s32 1, %s1475_s17 }
   0x6   : > { %p31_p0 = scmp.ge.s32.totalorder %s29_s23, 2  ;;  %p139_p1 = scmp.ne.s32.totalorder %s1475_s17, %s1471_s16 }
   0x7   : > { %p140_p2 = scmp.eq.s32.totalorder %s1273_s21, 1  ;;  %p145_p3 = scmp.ne.s32.totalorder %s1471_s16, %s1467_s15 }
   0x8   : > { %s2204_s23 = smov (%p31_p0, %s29_s23), 0  ;;  %p146_p5 = scmp.eq.s32.totalorder %s1274_s22, 1 }
   0x9   : > { %p1557_p4 = por %p140_p2, %p139_p1  ;;  %s124_s26 = ssub.s32 %s1483_s19, %s2204_s23 }
   0xa   : > { %p1277_p6 = scmp.ge.s32.totalorder %s1487_s20, 1  ;;  %p127_p7 = scmp.eq.s32.totalorder %s124_s26, 0 }
   0xb   : > { %p1564_p8 = por %p146_p5, %p145_p3  ;;  %p186_p9 = scmp.lt.s32.totalorder %s1487_s20, 3 }
   0xc   : > { %s1570_s28 = scalar_select %p127_p7, %s1475_s17, %s129_s24  }
   0xd   : > { %p187_p10 = pnand %p1277_p6, %p186_p9 }
   0xf   : > { %190 = sbr.rel (%p187_p10) target bundleno = 648 (0x288), region = 36 }
  0x14   : > { %p217_p11 = scmp.lt.s32.totalorder %s1479_s18, 1  ;;  %v1489_v0 = vmov 0.0   ;;  %vm470_vm0 = vcmask 1044480   ;;  %v227_v3 = vld [vmem:[%s2178_s1] sm:$0xff]  ;;  %vm289_vm1 = vcmask 39936   ;;  %v228_v4 = vld [vmem:[%s2178_s1 + $0x8] sm:$0xff] }
  0x15   : > { %541 = vmatprep.mubr.f32.mxu0 %v1489_v0  ;;  %769 = vmatprep.mubr.f32.mxu1 %v1489_v0  ;;  %v265_v5 = vld [vmem:[%s2178_s1 + $0x130] sm:$0xff]  ;;  %v266_v6 = vld [vmem:[%s2178_s1 + $0x138] sm:$0xff]  ;;  %v267_v8 = vld [vmem:[%s2178_s1 + $0x140] sm:$0xff]  ;;  %vm1032_vm2 = vcmask 785408   ;;  %s213_s10 = sand.u32 1, %s1471_s16   ;;  %s1350_s12 = sshll.u32 %s1479_s18, 8 }
  0x16   : > { %s218_s29 = scalar_select %p217_p11, %s1479_s18, 1  ;;  %v229_v7 = vld [vmem:[%s2178_s1 + $0x10] sm:$0xff]  ;;  %v230_v9 = vld [vmem:[%s2178_s1 + $0x18] sm:$0xff]  ;;  %v268_v10 = vld [vmem:[%s2178_s1 + $0x148] sm:$0xff] }
  0x17   : > { %v231_v11 = vld [vmem:[%s2178_s1 + $0x20] sm:$0xff]  ;;  %v269_v12 = vld [vmem:[%s2178_s1 + $0x150] sm:$0xff]  ;;  %v232_v13 = vld [vmem:[%s2178_s1 + $0x28] sm:$0xff]  ;;  %s1278_s11 = sshll.u32 %s213_s10, 4  ;;  %s1195_s24 = scalar_lea.hbm %s2181_s4, %s1350_s12 }
  0x18   : > { %s1349_s30 = sshll.u32 %s218_s29, 4  ;;  %v270_v14 = vld [vmem:[%s2178_s1 + $0x158] sm:$0xff]  ;;  %v233_v15 = vld [vmem:[%s2178_s1 + $0x30] sm:$0xff]  ;;  %v271_v16 = vld [vmem:[%s2178_s1 + $0x160] sm:$0xff]  ;;  %s215_s13 = scalar_lea.vmem [#allocation2], %s1278_s11 }
  0x19   : > { %s224_s7 = scalar_lea.vmem %s2177_s0, %s1349_s30  ;;  %v234_v17 = vld [vmem:[%s2178_s1 + $0x38] sm:$0xff]  ;;  %v272_v18 = vld [vmem:[%s2178_s1 + $0x168] sm:$0xff]  ;;  %v235_v19 = vld [vmem:[%s2178_s1 + $0x40] sm:$0xff]  ;;  %s1197_s14 = sshll.u32 %s215_s13, 4  ;;  %s1198_s14 = int_to_ptr.vmem [resolvable:$true] %s1197_s14 }
  0x1a   : > { %v288_v1 = vld [vmem:[%s224_s7 + $0x8] sm:$0x1f]  ;;  %v287_v2 = vld [vmem:[%s224_s7] sm:$0x1f]  ;;  %v273_v20 = vld [vmem:[%s2178_s1 + $0x170] sm:$0xff]  ;;  %s1181_s26 = scalar_lea.sflag [#allocation3], %s213_s10 }
  0x1b   : > { %1281 = vmatprep.subr.msk.mxu0 %vm470_vm0, %v288_v1  ;;  %1351 = vmatprep.subr.msk.mxu1 %vm470_vm0, %v288_v1  ;;  %v236_v21 = vld [vmem:[%s2178_s1 + $0x48] sm:$0xff]  ;;  %v274_v22 = vld [vmem:[%s2178_s1 + $0x178] sm:$0xff]  ;;  %v237_v23 = vld [vmem:[%s2178_s1 + $0x50] sm:$0xff]  ;;  %s1411_s29 = scalar_lea.vmem %s1198_s14, 256  ;;  %s1491_s18 = smov [#allocation2]  }
  0x1c   : > { %1282 = vmatpush1.msk.msra.mxu0 %vm470_vm0, %v287_v2  ;;  %1352 = vmatpush1.msk.msra.mxu1 %vm470_vm0, %v287_v2  ;;  %v275_v24 = vld [vmem:[%s2178_s1 + $0x180] sm:$0xff]  ;;  %v238_v25 = vld [vmem:[%s2178_s1 + $0x58] sm:$0xff]  ;;  %v276_v26 = vld [vmem:[%s2178_s1 + $0x188] sm:$0xff]  ;;  %p1412_p12 = scmp.ne.s32.totalorder %s1198_s14, %s1411_s29  ;;  %s1415_s30 = sshll.u32 %s1491_s18, 4  ;;  %s1416_s30 = int_to_ptr.vmem [resolvable:$false] %s1415_s30 }
  0x1d   : > { %1283 = vmatmul.mubr.msk.f32.vlgmr.msra.gmra.mxu0 %vm289_vm1, %v227_v3  ;;  %1321 = vmatmul.mubr.msk.f32.vlgmr.msra.gmra.mxu1 %vm289_vm1, %v265_v5  ;;  %v239_v27 = vld [vmem:[%s2178_s1 + $0x60] sm:$0xff]  ;;  %v277_v28 = vld [vmem:[%s2178_s1 + $0x190] sm:$0xff]  ;;  %v240_v29 = vld [vmem:[%s2178_s1 + $0x68] sm:$0xff]  ;;  %s1417_s5 = scalar_lea.vmem %s1416_s30, 512  ;;  %p1418_p1 = scmp.lt.s32.totalorder %s1198_s14, %s1416_s30 }
  0x1e   : > { %547 = vmatprep.mubr.f32.mxu0 %v1489_v0  ;;  %775 = vmatprep.mubr.f32.mxu1 %v1489_v0  ;;  %v278_v30 = vld [vmem:[%s2178_s1 + $0x198] sm:$0xff]  ;;  %v241_v31 = vld [vmem:[%s2178_s1 + $0x70] sm:$0xff]  ;;  %v279_v32 = vld [vmem:[%s2178_s1 + $0x1a0] sm:$0xff]  ;;  %p1413_p13 = pnand %p1412_p12, %p1557_p4  ;;  %p1419_p2 = scmp.lt.s32.totalorder %s1417_s5, %s1411_s29 }
  0x1f   : > { %v242_v33 = vld [vmem:[%s2178_s1 + $0x78] sm:$0xff]  ;;  %v280_v34 = vld [vmem:[%s2178_s1 + $0x1a8] sm:$0xff]  ;;  %v243_v35 = vld [vmem:[%s2178_s1 + $0x80] sm:$0xff] }
  0x20   : > { %v281_v36 = vld [vmem:[%s2178_s1 + $0x1b0] sm:$0xff]  ;;  %v244_v37 = vld [vmem:[%s2178_s1 + $0x88] sm:$0xff]  ;;  %v282_v38 = vld [vmem:[%s2178_s1 + $0x1b8] sm:$0xff]  ;;  %p1414_p0 = pneg %p1413_p13  ;;  %p1420_p3 = por %p1419_p2, %p1418_p1 }
  0x21   : > { %1284 = vmatmul.mubr.msk.f32.gmra.mxu0 %vm289_vm1, %v228_v4  ;;  %1322 = vmatmul.mubr.msk.f32.gmra.mxu1 %vm289_vm1, %v266_v6  ;;  %v245_v39 = vld [vmem:[%s2178_s1 + $0x90] sm:$0xff]  ;;  %v283_v40 = vld [vmem:[%s2178_s1 + $0x1c0] sm:$0xff]  ;;  %v246_v41 = vld [vmem:[%s2178_s1 + $0x98] sm:$0xff] }
  0x22   : > { %553 = vmatprep.mubr.f32.mxu0 %v1489_v0  ;;  %781 = vmatprep.mubr.f32.mxu1 %v1489_v0  ;;  %v284_v42 = vld [vmem:[%s2178_s1 + $0x1c8] sm:$0xff]  ;;  %v247_v43 = vld [vmem:[%s2178_s1 + $0xa0] sm:$0xff]  ;;  %v285_v44 = vld [vmem:[%s2178_s1 + $0x1d0] sm:$0xff]  ;;  %p1421_p5 = pnand %p1420_p3, %p1414_p0 }
  0x23   : > { %v248_v45 = vld [vmem:[%s2178_s1 + $0xa8] sm:$0xff]  ;;  %v286_v46 = vld [vmem:[%s2178_s1 + $0x1d8] sm:$0xff]  ;;  %v249_v47 = vld [vmem:[%s2178_s1 + $0xb0] sm:$0xff] }
  0x24   : > { %v250_v48 = vld [vmem:[%s2178_s1 + $0xb8] sm:$0xff]  ;;  %v251_v49 = vld [vmem:[%s2178_s1 + $0xc0] sm:$0xff]  ;;  %v252_v50 = vld [vmem:[%s2178_s1 + $0xc8] sm:$0xff] }
  0x25   : > { %1285 = vmatmul.mubr.msk.f32.gmra.mxu0 %vm289_vm1, %v229_v7  ;;  %1323 = vmatmul.mubr.msk.f32.gmra.mxu1 %vm289_vm1, %v267_v8  ;;  %v253_v51 = vld [vmem:[%s2178_s1 + $0xd0] sm:$0xff]  ;;  %v254_v52 = vld [vmem:[%s2178_s1 + $0xd8] sm:$0xff]  ;;  %v255_v53 = vld [vmem:[%s2178_s1 + $0xe0] sm:$0xff] }
  0x26   : > { %559 = vmatprep.mubr.f32.mxu0 %v1489_v0  ;;  %787 = vmatprep.mubr.f32.mxu1 %v1489_v0  ;;  %v256_v54 = vld [vmem:[%s2178_s1 + $0xe8] sm:$0xff]  ;;  %v257_v55 = vld [vmem:[%s2178_s1 + $0xf0] sm:$0xff]  ;;  %v258_v56 = vld [vmem:[%s2178_s1 + $0xf8] sm:$0xff] }
  0x27   : > { %v259_v57 = vld [vmem:[%s2178_s1 + $0x100] sm:$0xff]  ;;  %v260_v58 = vld [vmem:[%s2178_s1 + $0x108] sm:$0xff]  ;;  %v261_v59 = vld [vmem:[%s2178_s1 + $0x110] sm:$0xff] }
  0x28   : > { %v262_v60 = vld [vmem:[%s2178_s1 + $0x118] sm:$0xff]  ;;  %v263_v61 = vld [vmem:[%s2178_s1 + $0x120] sm:$0xff]  ;;  %v264_v62 = vld [vmem:[%s2178_s1 + $0x128] sm:$0xff] }
  0x29   : > { %1286 = vmatmul.mubr.msk.f32.gmra.mxu0 %vm289_vm1, %v230_v9  ;;  %1324 = vmatmul.mubr.msk.f32.gmra.mxu1 %vm289_vm1, %v268_v10 }
  0x2a   : > { %565 = vmatprep.mubr.f32.mxu0 %v1489_v0  ;;  %793 = vmatprep.mubr.f32.mxu1 %v1489_v0 }
  0x2d   : > { %1287 = vmatmul.mubr.msk.f32.gmra.mxu0 %vm289_vm1, %v231_v11  ;;  %1325 = vmatmul.mubr.msk.f32.gmra.mxu1 %vm289_vm1, %v269_v12 }
  0x2e   : > { %571 = vmatprep.mubr.f32.mxu0 %v1489_v0  ;;  %799 = vmatprep.mubr.f32.mxu1 %v1489_v0 }
  0x31   : > { %1288 = vmatmul.mubr.msk.f32.gmra.mxu0 %vm289_vm1, %v232_v13  ;;  %1326 = vmatmul.mubr.msk.f32.gmra.mxu1 %vm289_vm1, %v270_v14 }
  0x32   : > { %577 = vmatprep.mubr.f32.mxu0 %v1489_v0  ;;  %805 = vmatprep.mubr.f32.mxu1 %v1489_v0 }
  0x35   : > { %1289 = vmatmul.mubr.msk.f32.gmra.mxu0 %vm289_vm1, %v233_v15  ;;  %1327 = vmatmul.mubr.msk.f32.gmra.mxu1 %vm289_vm1, %v271_v16 }
  0x36   : > { %583 = vmatprep.mubr.f32.mxu0 %v1489_v0  ;;  %811 = vmatprep.mubr.f32.mxu1 %v1489_v0 }
  0x39   : > { %1290 = vmatmul.mubr.msk.f32.gmra.mxu0 %vm289_vm1, %v234_v17  ;;  %1328 = vmatmul.mubr.msk.f32.gmra.mxu1 %vm289_vm1, %v272_v18 }
  0x3a   : > { %589 = vmatprep.mubr.f32.mxu0 %v1489_v0  ;;  %817 = vmatprep.mubr.f32.mxu1 %v1489_v0 }
  0x3d   : > { %1291 = vmatmul.mubr.msk.f32.gmra.mxu0 %vm289_vm1, %v235_v19  ;;  %1329 = vmatmul.mubr.msk.f32.gmra.mxu1 %vm289_vm1, %v273_v20  ;;  %v1023_v19 = vld [vmem:[%s2179_s2 + $0x8] sm:$0xff] }
  0x3e   : > { %595 = vmatprep.mubr.f32.mxu0 %v1489_v0  ;;  %823 = vmatprep.mubr.f32.mxu1 %v1489_v0 }
  0x41   : > { %1292 = vmatmul.mubr.msk.f32.gmra.mxu0 %vm289_vm1, %v236_v21  ;;  %1330 = vmatmul.mubr.msk.f32.gmra.mxu1 %vm289_vm1, %v274_v22 }
  0x42   : > { %601 = vmatprep.mubr.f32.mxu0 %v1489_v0  ;;  %829 = vmatprep.mubr.f32.mxu1 %v1489_v0 }
  0x45   : > { %1293 = vmatmul.mubr.msk.f32.gmra.mxu0 %vm289_vm1, %v237_v23  ;;  %1331 = vmatmul.mubr.msk.f32.gmra.mxu1 %vm289_vm1, %v275_v24 }
  0x46   : > { %607 = vmatprep.mubr.f32.mxu0 %v1489_v0  ;;  %835 = vmatprep.mubr.f32.mxu1 %v1489_v0 }
  0x49   : > { %1294 = vmatmul.mubr.msk.f32.gmra.mxu0 %vm289_vm1, %v238_v25  ;;  %1332 = vmatmul.mubr.msk.f32.gmra.mxu1 %vm289_vm1, %v276_v26 }
  0x4a   : > { %613 = vmatprep.mubr.f32.mxu0 %v1489_v0  ;;  %841 = vmatprep.mubr.f32.mxu1 %v1489_v0 }
  0x4d   : > { %1295 = vmatmul.mubr.msk.f32.gmra.mxu0 %vm289_vm1, %v239_v27  ;;  %1333 = vmatmul.mubr.msk.f32.gmra.mxu1 %vm289_vm1, %v277_v28 }
  0x4e   : > { %619 = vmatprep.mubr.f32.mxu0 %v1489_v0  ;;  %847 = vmatprep.mubr.f32.mxu1 %v1489_v0 }
  0x51   : > { %1296 = vmatmul.mubr.msk.f32.gmra.mxu0 %vm289_vm1, %v240_v29  ;;  %1334 = vmatmul.mubr.msk.f32.gmra.mxu1 %vm289_vm1, %v278_v30 }
  0x52   : > { %625 = vmatprep.mubr.f32.mxu0 %v1489_v0  ;;  %853 = vmatprep.mubr.f32.mxu1 %v1489_v0 }
  0x55   : > { %1297 = vmatmul.mubr.msk.f32.gmra.mxu0 %vm289_vm1, %v241_v31  ;;  %1335 = vmatmul.mubr.msk.f32.gmra.mxu1 %vm289_vm1, %v279_v32 }
  0x56   : > { %631 = vmatprep.mubr.f32.mxu0 %v1489_v0  ;;  %859 = vmatprep.mubr.f32.mxu1 %v1489_v0 }
  0x59   : > { %1298 = vmatmul.mubr.msk.f32.gmra.mxu0 %vm289_vm1, %v242_v33  ;;  %1336 = vmatmul.mubr.msk.f32.gmra.mxu1 %vm289_vm1, %v280_v34 }
  0x5a   : > { %637 = vmatprep.mubr.f32.mxu0 %v1489_v0  ;;  %865 = vmatprep.mubr.f32.mxu1 %v1489_v0 }
  0x5d   : > { %1299 = vmatmul.mubr.msk.f32.gmra.mxu0 %vm289_vm1, %v243_v35  ;;  %1337 = vmatmul.mubr.msk.f32.gmra.mxu1 %vm289_vm1, %v281_v36 }
  0x5e   : > { %643 = vmatprep.mubr.f32.mxu0 %v1489_v0  ;;  %871 = vmatprep.mubr.f32.mxu1 %v1489_v0 }
  0x61   : > { %1300 = vmatmul.mubr.msk.f32.gmra.mxu0 %vm289_vm1, %v244_v37  ;;  %1338 = vmatmul.mubr.msk.f32.gmra.mxu1 %vm289_vm1, %v282_v38 }
  0x62   : > { %649 = vmatprep.mubr.f32.mxu0 %v1489_v0  ;;  %877 = vmatprep.mubr.f32.mxu1 %v1489_v0 }
  0x65   : > { %1301 = vmatmul.mubr.msk.f32.gmra.mxu0 %vm289_vm1, %v245_v39  ;;  %1339 = vmatmul.mubr.msk.f32.gmra.mxu1 %vm289_vm1, %v283_v40 }
  0x66   : > { %655 = vmatprep.mubr.f32.mxu0 %v1489_v0  ;;  %883 = vmatprep.mubr.f32.mxu1 %v1489_v0 }
  0x69   : > { %1302 = vmatmul.mubr.msk.f32.gmra.mxu0 %vm289_vm1, %v246_v41  ;;  %1340 = vmatmul.mubr.msk.f32.gmra.mxu1 %vm289_vm1, %v284_v42 }
  0x6a   : > { %661 = vmatprep.mubr.f32.mxu0 %v1489_v0  ;;  %889 = vmatprep.mubr.f32.mxu1 %v1489_v0 }
  0x6d   : > { %1303 = vmatmul.mubr.msk.f32.gmra.mxu0 %vm289_vm1, %v247_v43  ;;  %1341 = vmatmul.mubr.msk.f32.gmra.mxu1 %vm289_vm1, %v285_v44 }
  0x6e   : > { %667 = vmatprep.mubr.f32.mxu0 %v1489_v0  ;;  %895 = vmatprep.mubr.f32.mxu1 %v1489_v0 }
  0x71   : > { %1304 = vmatmul.mubr.msk.f32.gmra.mxu0 %vm289_vm1, %v248_v45  ;;  %1342 = vmatmul.mubr.msk.f32.gmra.mxu1 %vm289_vm1, %v286_v46 }
  0x72   : > { %673 = vmatprep.mubr.f32.mxu0 %v1489_v0  ;;  %1100 = vmatprep.mubr.f32.mxu1 %v1023_v19 }
  0x75   : > { %1305 = vmatmul.mubr.msk.f32.gmra.mxu0 %vm289_vm1, %v249_v47 }
  0x76   : > { %679 = vmatprep.mubr.f32.mxu0 %v1489_v0 }
  0x79   : > { %1306 = vmatmul.mubr.msk.f32.gmra.mxu0 %vm289_vm1, %v250_v48 }
  0x7a   : > { %685 = vmatprep.mubr.f32.mxu0 %v1489_v0 }
  0x7d   : > { %1307 = vmatmul.mubr.msk.f32.gmra.mxu0 %vm289_vm1, %v251_v49 }
  0x7e   : > { %691 = vmatprep.mubr.f32.mxu0 %v1489_v0 }
  0x81   : > { %1308 = vmatmul.mubr.msk.f32.gmra.mxu0 %vm289_vm1, %v252_v50 }
  0x82   : > { %697 = vmatprep.mubr.f32.mxu0 %v1489_v0 }
  0x85   : > { %1309 = vmatmul.mubr.msk.f32.gmra.mxu0 %vm289_vm1, %v253_v51 }
  0x86   : > { %703 = vmatprep.mubr.f32.mxu0 %v1489_v0 }
  0x89   : > { %1310 = vmatmul.mubr.msk.f32.gmra.mxu0 %vm289_vm1, %v254_v52 }
  0x8a   : > { %709 = vmatprep.mubr.f32.mxu0 %v1489_v0 }
  0x8d   : > { %1311 = vmatmul.mubr.msk.f32.gmra.mxu0 %vm289_vm1, %v255_v53 }
  0x8e   : > { %715 = vmatprep.mubr.f32.mxu0 %v1489_v0 }
  0x91   : > { %1312 = vmatmul.mubr.msk.f32.gmra.mxu0 %vm289_vm1, %v256_v54 }
  0x92   : > { %721 = vmatprep.mubr.f32.mxu0 %v1489_v0 }
  0x95   : > { %1313 = vmatmul.mubr.msk.f32.gmra.mxu0 %vm289_vm1, %v257_v55 }
  0x96   : > { %727 = vmatprep.mubr.f32.mxu0 %v1489_v0 }
  0x99   : > { %1314 = vmatmul.mubr.msk.f32.gmra.mxu0 %vm289_vm1, %v258_v56 }
  0x9a   : > { %733 = vmatprep.mubr.f32.mxu0 %v1489_v0 }
  0x9d   : > { %1315 = vmatmul.mubr.msk.f32.gmra.mxu0 %vm289_vm1, %v259_v57 }
  0x9e   : > { %739 = vmatprep.mubr.f32.mxu0 %v1489_v0 }
  0xa1   : > { %1316 = vmatmul.mubr.msk.f32.gmra.mxu0 %vm289_vm1, %v260_v58 }
  0xa2   : > { %745 = vmatprep.mubr.f32.mxu0 %v1489_v0 }
  0xa5   : > { %1317 = vmatmul.mubr.msk.f32.gmra.mxu0 %vm289_vm1, %v261_v59 }
  0xa6   : > { %751 = vmatprep.mubr.f32.mxu0 %v1489_v0 }
  0xa9   : > { %1318 = vmatmul.mubr.msk.f32.gmra.mxu0 %vm289_vm1, %v262_v60 }
  0xaa   : > { %757 = vmatprep.mubr.f32.mxu0 %v1489_v0 }
  0xad   : > { %1319 = vmatmul.mubr.msk.f32.gmra.mxu0 %vm289_vm1, %v263_v61 }
  0xae   : > { %763 = vmatprep.mubr.f32.mxu0 %v1489_v0 }
  0xb1   : > { %1320 = vmatmul.mubr.msk.f32.gmra.mxu0 %vm289_vm1, %v264_v62 }
  0xdd   : > { %v1877_v63 = vpop.f32.mrf.mxu0  ;;  %v1895_v8 = vpop.f32.mrf.mxu1 }
  0xdf   : > { %v1879_v1 = vpop.f32.mrf.mxu0  ;;  %v1901_v11 = vpop.f32.mrf.mxu1 }
  0xe1   : > { %v1881_v2 = vpop.f32.mrf.mxu0  ;;  %v1907_v14 = vpop.f32.mrf.mxu1 }
  0xe3   : > { %v1883_v3 = vpop.f32.mrf.mxu0  ;;  %v1913_v17 = vpop.f32.mrf.mxu1 }
  0xe5   : > { %v1885_v4 = vpop.f32.mrf.mxu0  ;;  %v1922_v21 = vpop.f32.mrf.mxu1 }
  0xe7   : > { %v1887_v5 = vpop.f32.mrf.mxu0  ;;  %v1926_v24 = vpop.f32.mrf.mxu1 }
  0xe9   : > { %v1889_v6 = vpop.f32.mrf.mxu0  ;;  %v1928_v27 = vpop.f32.mrf.mxu1 }
  0xeb   : > { %v1891_v0 = vpop.f32.mrf.mxu0  ;;  %v1930_v30 = vpop.f32.mrf.mxu1 }
  0xed   : > { %v1893_v7 = vpop.f32.mrf.mxu0  ;;  %v1932_v33 = vpop.f32.mrf.mxu1 }
  0xef   : > { %v1897_v9 = vpop.f32.mrf.mxu0  ;;  %v1934_v36 = vpop.f32.mrf.mxu1 }
  0xf1   : > { %v1899_v10 = vpop.f32.mrf.mxu0  ;;  %v1936_v39 = vpop.f32.mrf.mxu1 }
  0xf3   : > { %v1903_v12 = vpop.f32.mrf.mxu0  ;;  %v1938_v42 = vpop.f32.mrf.mxu1 }
  0xf5   : > { %v1905_v13 = vpop.f32.mrf.mxu0  ;;  %v1942_v47 = vpop.f32.mrf.mxu1 }
  0xf7   : > { %v1909_v15 = vpop.f32.mrf.mxu0  ;;  %v1948_v54 = vpop.f32.mrf.mxu1 }
  0xf9   : > { %v1911_v16 = vpop.f32.mrf.mxu0  ;;  %v1954_v61 = vpop.f32.mrf.mxu1 }
  0xfb   : > { %v1915_v18 = vpop.f32.mrf.mxu0 }
  0xfd   : > { %v1920_v20 = vpop.f32.mrf.mxu0 }
  0xff   : > { %v1924_v22 = vpop.f32.mrf.mxu0 }
 0x101   : > { %v597_v23 = vpop.f32.mrf.mxu0 }
 0x103   : > { %v599_v25 = vpop.f32.mrf.mxu0 }
 0x105   : > { %v603_v26 = vpop.f32.mrf.mxu0 }
 0x106   : > { %v922_v19 = vmax.f32 %v603_v26, 0.0  ;;  %v917_v26 = vmax.f32 %v1915_v18, 0.0  ;;  %v912_v18 = vmax.f32 %v1899_v10, 0.0 }
 0x107   : > { %v605_v28 = vpop.f32.mrf.mxu0 }
 0x108   : > { %v923_v62 = vmax.f32 %v605_v28, 0.0 }
 0x109   : > { %v609_v29 = vpop.f32.mrf.mxu0 }
 0x10a   : > { %v924_v59 = vmax.f32 %v609_v29, 0.0  ;;  %v919_v29 = vmax.f32 %v1924_v22, 0.0  ;;  %v914_v22 = vmax.f32 %v1905_v13, 0.0  ;;  %v909_v13 = vmax.f32 %v1891_v0, 0.0 }
 0x10b   : > { %v611_v31 = vpop.f32.mrf.mxu0  ;;  %v1490_v0 = vmov 0  }
 0x10c   : > { %v925_v58 = vmax.f32 %v611_v31, 0.0  ;;  %v1960_v31 = vpop.f32.mrf.mxu1  ;;  %1410 = vset.pattern.permute.xlu0 %v1490_v0 }
 0x10d   : > { %v615_v32 = vpop.f32.mrf.mxu0 }
 0x10e   : > { %v926_v56 = vmax.f32 %v615_v32, 0.0  ;;  %v920_v32 = vmax.f32 %v597_v23, 0.0  ;;  %v1970_v23 = vpop.f32.mrf.mxu1 }
 0x10f   : > { %v617_v34 = vpop.f32.mrf.mxu0 }
 0x110   : > { %v927_v55 = vmax.f32 %v617_v34, 0.0  ;;  %v921_v34 = vmax.f32 %v599_v25, 0.0  ;;  %v916_v25 = vmax.f32 %v1911_v16, 0.0  ;;  %v1980_v16 = vpop.f32.mrf.mxu1 }
 0x111   : > { %v621_v35 = vpop.f32.mrf.mxu0 }
 0x112   : > { %v928_v52 = vmax.f32 %v621_v35, 0.0  ;;  %v1990_v10 = vpop.f32.mrf.mxu1 }
 0x113   : > { %v623_v37 = vpop.f32.mrf.mxu0 }
 0x114   : > { %v929_v51 = vmax.f32 %v623_v37, 0.0 }
 0x115   : > { %v627_v38 = vpop.f32.mrf.mxu0 }
 0x116   : > { %v930_v49 = vmax.f32 %v627_v38, 0.0  ;;  %v918_v38 = vmax.f32 %v1920_v20, 0.0  ;;  %v913_v20 = vmax.f32 %v1903_v12, 0.0  ;;  %v908_v12 = vmax.f32 %v1889_v6, 0.0 }
 0x117   : > { %v629_v40 = vpop.f32.mrf.mxu0  ;;  %v905_v6 = vmax.f32 %v1883_v3, 0.0 }
 0x118   : > { %v931_v48 = vmax.f32 %v629_v40, 0.0 }
 0x119   : > { %v633_v41 = vpop.f32.mrf.mxu0 }
 0x11a   : > { %v932_v45 = vmax.f32 %v633_v41, 0.0  ;;  %v915_v41 = vmax.f32 %v1909_v15, 0.0  ;;  %v910_v15 = vmax.f32 %v1893_v7, 0.0  ;;  %v1026_v7 = vld [vmem:[%s2180_s3] sm:$0xff] }
 0x11b   : > { %v635_v43 = vpop.f32.mrf.mxu0  ;;  %1029 = vperm.xlu0 %1410, %v1026_v7  }
 0x11c   : > { %v933_v44 = vmax.f32 %v635_v43, 0.0 }
 0x11d   : > { %v1940_v46 = vpop.f32.mrf.mxu0 }
 0x11e   : > { %1036 = vmatprep.subr.mxu1 %v933_v44 }
 0x11f   : > { %v1944_v50 = vpop.f32.mrf.mxu0  ;;  %1037 = vmatpush1.msra.mxu1 %v932_v45  ;;  %v911_v45 = vmax.f32 %v1897_v9, 0.0  ;;  %v906_v9 = vmax.f32 %v1885_v4, 0.0  ;;  %v902_v4 = vmax.f32 %v1877_v63, 0.0 }
 0x120   : > { %1038 = vmatprep.subr.mxu1 %v931_v48 }
 0x121   : > { %v1946_v53 = vpop.f32.mrf.mxu0  ;;  %1039 = vmatpush1.msra.mxu1 %v930_v49 }
 0x122   : > { %1040 = vmatprep.subr.mxu1 %v929_v51  ;;  %v907_v51 = vmax.f32 %v1887_v5, 0.0  ;;  %v2003_v5 = vpop.f32.mrf.mxu1 }
 0x123   : > { %v1950_v57 = vpop.f32.mrf.mxu0  ;;  %1041 = vmatpush1.msra.mxu1 %v928_v52 }
 0x124   : > { %1042 = vmatprep.subr.mxu1 %v927_v55  ;;  %v904_v55 = vmax.f32 %v1881_v2, 0.0  ;;  %v2011_v3 = vpop.f32.mrf.mxu1 }
 0x125   : > { %v1952_v60 = vpop.f32.mrf.mxu0  ;;  %1043 = vmatpush1.msra.mxu1 %v926_v56  ;;  %2184 = vst [vmem:[#allocation5_spill] sm:$0xff] %v2011_v3 }
 0x126   : > { %1044 = vmatprep.subr.mxu1 %v925_v58  ;;  %v903_v58 = vmax.f32 %v1879_v1, 0.0 }
 0x127   : > { %v1956_v35 = vpop.f32.mrf.mxu0  ;;  %1045 = vmatpush1.msra.mxu1 %v924_v59 }
 0x128   : > { %1046 = vmatprep.subr.mxu1 %v923_v62 }
 0x129   : > { %v1958_v37 = vpop.f32.mrf.mxu0  ;;  %1047 = vmatpush1.msra.mxu1 %v922_v19 }
 0x12a   : > { %1048 = vmatprep.subr.mxu1 %v921_v34  ;;  %v2013_v34 = vpop.f32.mrf.mxu1 }
 0x12b   : > { %v1964_v40 = vpop.f32.mrf.mxu0  ;;  %1049 = vmatpush1.msra.mxu1 %v920_v32  ;;  %2185 = vst [vmem:[#allocation6_spill] sm:$0xff] %v2013_v34 }
 0x12c   : > { %1050 = vmatprep.subr.mxu1 %v919_v29 }
 0x12d   : > { %v1968_v28 = vpop.f32.mrf.mxu0  ;;  %1051 = vmatpush1.msra.mxu1 %v918_v38  ;;  %v2015_v38 = vpop.f32.mrf.mxu1 }
 0x12e   : > { %1052 = vmatprep.subr.mxu1 %v917_v26  ;;  %2186 = vst [vmem:[#allocation7_spill] sm:$0xff] %v2015_v38 }
 0x12f   : > { %v1974_v43 = vpop.f32.mrf.mxu0  ;;  %1053 = vmatpush1.msra.mxu1 %v916_v25  ;;  %v2017_v63 = vpop.f32.mrf.mxu1 }
 0x130   : > { %1054 = vmatprep.subr.mxu1 %v915_v41  ;;  %2187 = vst [vmem:[#allocation8_spill] sm:$0xff] %v2017_v63 }
 0x131   : > { %v1978_v44 = vpop.f32.mrf.mxu0  ;;  %1055 = vmatpush1.msra.mxu1 %v914_v22  ;;  %v2019_v22 = vpop.f32.mrf.mxu1 }
 0x132   : > { %1056 = vmatprep.subr.mxu1 %v913_v20  ;;  %2188 = vst [vmem:[#allocation9_spill] sm:$0xff] %v2019_v22 }
 0x133   : > { %v1984_v48 = vpop.f32.mrf.mxu0  ;;  %1057 = vmatpush1.msra.mxu1 %v912_v18 }
 0x134   : > { %1058 = vmatprep.subr.mxu1 %v911_v45  ;;  %v2021_v45 = vpop.f32.mrf.mxu1 }
 0x135   : > { %v1988_v49 = vpop.f32.mrf.mxu0  ;;  %1059 = vmatpush1.msra.mxu1 %v910_v15  ;;  %2189 = vst [vmem:[#allocation10_spill] sm:$0xff] %v2021_v45 }
 0x136   : > { %1060 = vmatprep.subr.mxu1 %v909_v13 }
 0x137   : > { %v1997_v52 = vpop.f32.mrf.mxu0  ;;  %1061 = vmatpush1.msra.mxu1 %v908_v12  ;;  %v2023_v12 = vpop.f32.mrf.mxu1 }
 0x138   : > { %1062 = vmatprep.subr.mxu1 %v907_v51  ;;  %2190 = vst [vmem:[#allocation11_spill] sm:$0xff] %v2023_v12 }
 0x139   : > { %v2001_v56 = vpop.f32.mrf.mxu0  ;;  %1063 = vmatpush1.msra.mxu1 %v906_v9  ;;  %v2025_v9 = vpop.f32.mrf.mxu1 }
 0x13a   : > { %1064 = vmatprep.subr.mxu1 %v905_v6 }
 0x13b   : > { %v2007_v59 = vpop.f32.mrf.mxu0  ;;  %1065 = vmatpush1.msra.mxu1 %v904_v55 }
 0x13c   : > { %1066 = vmatprep.subr.mxu1 %v903_v58  ;;  %v2027_v58 = vpop.f32.mrf.mxu1 }
 0x13d   : > { %v2009_v62 = vpop.f32.mrf.mxu0  ;;  %1067 = vmatpush1.msra.mxu1 %v902_v4 }
 0x13e   : > { %v2031_v22 = vpop.f32.mrf.mxu1 }
 0x13f   : > { %v689_v2 = vpop.f32.mrf.mxu0 }
 0x141   : > { %v693_v19 = vpop.f32.mrf.mxu0 }
 0x143   : > { %v695_v32 = vpop.f32.mrf.mxu0 }
 0x145   : > { %v699_v29 = vpop.f32.mrf.mxu0 }
 0x147   : > { %v701_v1 = vpop.f32.mrf.mxu0 }
 0x149   : > { %v705_v26 = vpop.f32.mrf.mxu0 }
 0x14b   : > { %v707_v25 = vpop.f32.mrf.mxu0 }
 0x14d   : > { %v711_v41 = vpop.f32.mrf.mxu0 }
 0x14e   : > { %v958_v12 = vmax.f32 %v711_v41, 0.0  ;;  %v946_v41 = vmax.f32 %v1988_v49, 0.0  ;;  %v940_v49 = vmax.f32 %v1958_v37, 0.0 }
 0x14f   : > { %v713_v20 = vpop.f32.mrf.mxu0 }
 0x150   : > { %v959_v45 = vmax.f32 %v713_v20, 0.0 }
 0x151   : > { %v717_v18 = vpop.f32.mrf.mxu0 }
 0x152   : > { %v960_v38 = vmax.f32 %v717_v18, 0.0  ;;  %v954_v18 = vmax.f32 %v699_v29, 0.0 }
 0x153   : > { %v719_v15 = vpop.f32.mrf.mxu0 }
 0x154   : > { %v961_v34 = vmax.f32 %v719_v15, 0.0  ;;  %v955_v15 = vmax.f32 %v701_v1, 0.0  ;;  %v948_v1 = vmax.f32 %v2001_v56, 0.0 }
 0x155   : > { %v723_v13 = vpop.f32.mrf.mxu0 }
 0x156   : > { %v962_v3 = vmax.f32 %v723_v13, 0.0  ;;  %v2035_v13 = vpop.f32.mrf.mxu1 }
 0x157   : > { %v725_v51 = vpop.f32.mrf.mxu0 }
 0x158   : > { %v963_v4 = vmax.f32 %v725_v51, 0.0 }
 0x159   : > { %v729_v7 = vpop.f32.mrf.mxu0 }
 0x15a   : > { %v964_v55 = vmax.f32 %v729_v7, 0.0  ;;  %v956_v7 = vmax.f32 %v705_v26, 0.0  ;;  %v950_v26 = vmax.f32 %v2009_v62, 0.0  ;;  %v944_v62 = vmax.f32 %v1978_v44, 0.0 }
 0x15b   : > { %v731_v0 = vpop.f32.mrf.mxu0 }
 0x15c   : > { %v965_v6 = vmax.f32 %v731_v0, 0.0  ;;  %v957_v0 = vmax.f32 %v707_v25, 0.0  ;;  %v949_v25 = vmax.f32 %v2007_v59, 0.0 }
 0x15d   : > { %v2029_v63 = vpop.f32.mrf.mxu0 }
 0x15e   : > { %1068 = vmatprep.subr.mxu1 %v965_v6  ;;  %v952_v6 = vmax.f32 %v693_v19, 0.0  ;;  %v947_v19 = vmax.f32 %v1997_v52, 0.0  ;;  %v941_v52 = vmax.f32 %v1964_v40, 0.0 }
 0x15f   : > { %1069 = vmatpush2.msra.mxu1 %v964_v55  ;;  %v2033_v51 = vpop.f32.mrf.mxu0  ;;  %v939_v55 = vmax.f32 %v1956_v35, 0.0  ;;  %v996_v35 = vmax.f32 %v1990_v10, 0.0 }
 0x160   : > { %1070 = vmatprep.subr.mxu1 %v963_v4  ;;  %v938_v4 = vmax.f32 %v1952_v60, 0.0  ;;  %v1022_v60 = vld [vmem:[%s2179_s2] sm:$0xff] }
 0x161   : > { %1071 = vmatpush2.msra.mxu1 %v962_v3  ;;  %v953_v3 = vmax.f32 %v695_v32, 0.0  ;;  %v2037_v20 = vpop.f32.mrf.mxu0 }
 0x162   : > { %1072 = vmatprep.subr.mxu1 %v961_v34  ;;  %v2039_v34 = vpop.f32.mrf.mxu1 }
 0x163   : > { %1073 = vmatpush2.msra.mxu1 %v960_v38  ;;  %v951_v38 = vmax.f32 %v689_v2, 0.0  ;;  %v2044_v29 = vpop.f32.mrf.mxu0  ;;  %v945_v2 = vmax.f32 %v1984_v48, 0.0 }
 0x164   : > { %1074 = vmatprep.subr.mxu1 %v959_v45  ;;  %v2046_v32 = vpop.f32.mrf.mxu1  ;;  %v943_v45 = vmax.f32 %v1974_v43, 0.0  ;;  %v937_v43 = vmax.f32 %v1950_v57, 0.0  ;;  %v997_v57 = vmax.f32 %v2003_v5, 0.0  ;;  %v993_v5 = vmax.f32 %v1960_v31, 0.0 }
 0x165   : > { %1075 = vmatpush2.msra.mxu1 %v958_v12  ;;  %v2052_v59 = vpop.f32.mrf.mxu0  ;;  %v942_v12 = vmax.f32 %v1968_v28, 0.0  ;;  %v936_v28 = vmax.f32 %v1946_v53, 0.0  ;;  %v1025_v53 = vld [vmem:[%s2179_s2 + $0x18] sm:$0xff] }
 0x166   : > { %1076 = vmatprep.subr.mxu1 %v957_v0  ;;  %v2054_v56 = vpop.f32.mrf.mxu1  ;;  %v935_v0 = vmax.f32 %v1944_v50, 0.0 }
 0x167   : > { %1077 = vmatpush2.msra.mxu1 %v956_v7  ;;  %v2060_v48 = vpop.f32.mrf.mxu0  ;;  %v934_v7 = vmax.f32 %v1940_v46, 0.0  ;;  %v995_v46 = vmax.f32 %v1980_v16, 0.0  ;;  %v990_v16 = vmax.f32 %v1942_v47, 0.0  ;;  %v984_v47 = vmax.f32 %v1928_v27, 0.0 }
 0x168   : > { %1078 = vmatprep.subr.mxu1 %v955_v15  ;;  %v2062_v44 = vpop.f32.mrf.mxu1  ;;  %v978_v27 = vmax.f32 %v1895_v8, 0.0  ;;  %v970_v8 = vmax.f32 %v2052_v59, 0.0 }
 0x169   : > { %1079 = vmatpush2.msra.mxu1 %v954_v18  ;;  %v2068_v40 = vpop.f32.mrf.mxu0  ;;  %v994_v18 = vmax.f32 %v1970_v23, 0.0  ;;  %v988_v23 = vmax.f32 %v1936_v39, 0.0  ;;  %v983_v39 = vmax.f32 %v1926_v24, 0.0 }
 0x16a   : > { %1080 = vmatprep.subr.mxu1 %v953_v3  ;;  %v2070_v37 = vpop.f32.mrf.mxu1  ;;  %v992_v3 = vmax.f32 %v1954_v61, 0.0  ;;  %v987_v61 = vmax.f32 %v1934_v36, 0.0  ;;  %v981_v36 = vmax.f32 %v1913_v17, 0.0 }
 0x16b   : > { %1081 = vmatpush2.msra.mxu1 %v952_v6  ;;  %v2082_v50 = vpop.f32.mrf.mxu0 }
 0x16c   : > { %1082 = vmatprep.subr.mxu1 %v951_v38  ;;  %v2084_v15 = vpop.f32.mrf.mxu1  ;;  %v991_v38 = vmax.f32 %v1948_v54, 0.0  ;;  %v985_v54 = vmax.f32 %v1930_v30, 0.0 }
 0x16d   : > { %1083 = vmatpush2.msra.mxu1 %v950_v26  ;;  %v759_v10 = vpop.f32.mrf.mxu0  ;;  %v989_v26 = vmax.f32 %v1938_v42, 0.0 }
 0x16e   : > { %1084 = vmatprep.subr.mxu1 %v949_v25  ;;  %v2090_v6 = vpop.f32.mrf.mxu1  ;;  %v974_v17 = vmax.f32 %v759_v10, 0.0 }
 0x16f   : > { %1085 = vmatpush2.msra.mxu1 %v948_v1  ;;  %v761_v31 = vpop.f32.mrf.mxu0  ;;  %v986_v1 = vmax.f32 %v1932_v33, 0.0  ;;  %v980_v33 = vmax.f32 %v1907_v14, 0.0  ;;  %v973_v14 = vmax.f32 %v2082_v50, 0.0  ;;  %v1009_v50 = vmax.f32 %v2039_v34, 0.0  ;;  %v2193_v34 = vld [vmem:[#allocation9_spill] sm:$0xff] }
 0x170   : > { %1086 = vmatprep.subr.mxu1 %v947_v19  ;;  %v2096_v25 = vpop.f32.mrf.mxu1 }
 0x171   : > { %1087 = vmatpush2.msra.mxu1 %v946_v41  ;;  %v765_v42 = vpop.f32.mrf.mxu0  ;;  %v982_v41 = vmax.f32 %v1922_v21, 0.0 }
 0x172   : > { %1088 = vmatprep.subr.mxu1 %v945_v2  ;;  %v887_v19 = vpop.f32.mrf.mxu1  ;;  %v976_v24 = vmax.f32 %v765_v42, 0.0 }
 0x173   : > { %1089 = vmatpush2.msra.mxu1 %v944_v62  ;;  %v767_v2 = vpop.f32.mrf.mxu0  ;;  %v979_v62 = vmax.f32 %v1901_v11, 0.0 }
 0x174   : > { %1090 = vmatprep.subr.mxu1 %v943_v45  ;;  %v891_v30 = vpop.f32.mrf.mxu1  ;;  %v977_v45 = vmax.f32 %v767_v2, 0.0 }
 0x175   : > { %1091 = vmatpush2.msra.mxu1 %v942_v12  ;;  %v975_v12 = vmax.f32 %v761_v31, 0.0  ;;  %v1018_v59 = vmax.f32 %v891_v30, 0.0 }
 0x176   : > { %1092 = vmatprep.subr.mxu1 %v941_v52  ;;  %v893_v21 = vpop.f32.mrf.mxu1  ;;  %v972_v52 = vmax.f32 %v2068_v40, 0.0  ;;  %v966_v40 = vmax.f32 %v2029_v63, 0.0  ;;  %v1013_v63 = vmax.f32 %v2070_v37, 0.0  ;;  %v1006_v37 = vmax.f32 %v2027_v58, 0.0  ;;  %v2196_v58 = vld [vmem:[#allocation6_spill] sm:$0xff] }
 0x177   : > { %1093 = vmatpush2.msra.mxu1 %v940_v49  ;;  %v971_v49 = vmax.f32 %v2060_v48, 0.0 }
 0x178   : > { %1094 = vmatprep.subr.mxu1 %v939_v55  ;;  %v897_v11 = vpop.f32.mrf.mxu1  ;;  %v969_v55 = vmax.f32 %v2044_v29, 0.0  ;;  %v1017_v29 = vmax.f32 %v887_v19, 0.0 }
 0x179   : > { %1095 = vmatpush2.msra.mxu1 %v938_v4  ;;  %v968_v4 = vmax.f32 %v2037_v20, 0.0  ;;  %v1020_v48 = vmax.f32 %v897_v11, 0.0  ;;  %v1016_v20 = vmax.f32 %v2096_v25, 0.0 }
 0x17a   : > { %1096 = vmatprep.subr.mxu1 %v937_v43  ;;  %v899_v43 = vpop.f32.mrf.mxu1 }
 0x17b   : > { %1097 = vmatpush2.msra.mxu1 %v936_v28  ;;  %v967_v28 = vmax.f32 %v2033_v51, 0.0  ;;  %v1014_v51 = vmax.f32 %v2084_v15, 0.0  ;;  %v1007_v15 = vmax.f32 %v2031_v22, 0.0  ;;  %v2195_v22 = vld [vmem:[#allocation7_spill] sm:$0xff] }
 0x17c   : > { %1098 = vmatprep.subr.mxu1 %v935_v0  ;;  %v1021_v0 = vmax.f32 %v899_v43, 0.0 }
 0x17d   : > { %1099 = vmatpush2.msra.mxu1 %v934_v7  ;;  %v1019_v7 = vmax.f32 %v893_v21, 0.0 }
 0x17e   : > { %1107 = vmatprep.subr.mxu1 %v997_v57  ;;  %1101 = vmatmul.mubr.f32.vlgmr.msra.gmra.mxu1 %v1022_v60  ;;  %v1015_v60 = vmax.f32 %v2090_v6, 0.0  ;;  %v1012_v57 = vmax.f32 %v2062_v44, 0.0  ;;  %v1005_v44 = vmax.f32 %v2025_v9, 0.0  ;;  %v1000_v6 = vmax.f32 %v2195_v22, 0.0 }
 0x17f   : > { %1108 = vmatpush1.msra.mxu1 %v996_v35  ;;  %1343 = vmatprep.mubr.msk.f32.mxu1 %vm1032_vm2, %v1025_v53  ;;  %v1011_v53 = vmax.f32 %v2054_v56, 0.0  ;;  %v1010_v35 = vmax.f32 %v2046_v32, 0.0  ;;  %v2191_v56 = vld [vmem:[#allocation11_spill] sm:$0xff]  ;;  %v2192_v32 = vld [vmem:[#allocation10_spill] sm:$0xff]  ;;  %v999_v9 = vmax.f32 %v2196_v58, 0.0 }
 0x180   : > { %1109 = vmatprep.subr.mxu1 %v995_v46  ;;  %v1008_v46 = vmax.f32 %v2035_v13, 0.0  ;;  %v2194_v13 = vld [vmem:[#allocation8_spill] sm:$0xff] }
 0x181   : > { %1110 = vmatpush1.msra.mxu1 %v994_v18  ;;  %v1004_v18 = vmax.f32 %v2191_v56, 0.0  ;;  %v1001_v10 = vmax.f32 %v2194_v13, 0.0 }
 0x182   : > { %1111 = vmatprep.subr.mxu1 %v993_v5  ;;  %v1003_v5 = vmax.f32 %v2192_v32, 0.0 }
 0x183   : > { %1112 = vmatpush1.msra.mxu1 %v992_v3  ;;  %v1002_v3 = vmax.f32 %v2193_v34, 0.0 }
 0x184   : > { %1113 = vmatprep.subr.mxu1 %v991_v38  ;;  %v2197_v38 = vld [vmem:[#allocation5_spill] sm:$0xff] }
 0x185   : > { %1114 = vmatpush1.msra.mxu1 %v990_v16  ;;  %v998_v16 = vmax.f32 %v2197_v38, 0.0 }
 0x186   : > { %1115 = vmatprep.subr.mxu1 %v989_v26  ;;  %v1024_v26 = vld [vmem:[%s2179_s2 + $0x10] sm:$0xff] }
 0x187   : > { %1116 = vmatpush1.msra.mxu1 %v988_v23 }
 0x188   : > { %1117 = vmatprep.subr.mxu1 %v987_v61 }
 0x189   : > { %1118 = vmatpush1.msra.mxu1 %v986_v1 }
 0x18a   : > { %1119 = vmatprep.subr.mxu1 %v985_v54 }
 0x18b   : > { %1120 = vmatpush1.msra.mxu1 %v984_v47 }
 0x18c   : > { %1121 = vmatprep.subr.mxu1 %v983_v39 }
 0x18d   : > { %1122 = vmatpush1.msra.mxu1 %v982_v41 }
 0x18e   : > { %1123 = vmatprep.subr.mxu1 %v981_v36 }
 0x18f   : > { %1124 = vmatpush1.msra.mxu1 %v980_v33 }
 0x190   : > { %1125 = vmatprep.subr.mxu1 %v979_v62 }
 0x191   : > { %1126 = vmatpush1.msra.mxu1 %v978_v27 }
 0x192   : > { %1127 = vmatprep.subr.mxu1 %v977_v45 }
 0x193   : > { %1128 = vmatpush1.msra.mxu1 %v976_v24 }
 0x194   : > { %1129 = vmatprep.subr.mxu1 %v975_v12 }
 0x195   : > { %1130 = vmatpush1.msra.mxu1 %v974_v17 }
 0x196   : > { %1131 = vmatprep.subr.mxu1 %v973_v14  ;;  %v1030_v31 = vpop.permute.xlu0 %1029 }
 0x197   : > { %1132 = vmatpush1.msra.mxu1 %v972_v52 }
 0x198   : > { %1133 = vmatprep.subr.mxu1 %v971_v49 }
 0x199   : > { %1134 = vmatpush1.msra.mxu1 %v970_v8 }
 0x19a   : > { %1135 = vmatprep.subr.mxu1 %v969_v55 }
 0x19b   : > { %1136 = vmatpush1.msra.mxu1 %v968_v4 }
 0x19c   : > { %1137 = vmatprep.subr.mxu1 %v967_v28 }
 0x19d   : > { %1138 = vmatpush1.msra.mxu1 %v966_v40 }
 0x19e   : > { %1147 = vmatprep.subr.mxu1 %v1021_v0 }
 0x19f   : > { %1148 = vmatpush2.msra.mxu1 %v1020_v48 }
 0x1a0   : > { %1149 = vmatprep.subr.mxu1 %v1019_v7 }
 0x1a1   : > { %1150 = vmatpush2.msra.mxu1 %v1018_v59 }
 0x1a2   : > { %1151 = vmatprep.subr.mxu1 %v1017_v29 }
 0x1a3   : > { %1152 = vmatpush2.msra.mxu1 %v1016_v20 }
 0x1a4   : > { %1153 = vmatprep.subr.mxu1 %v1015_v60 }
 0x1a5   : > { %1154 = vmatpush2.msra.mxu1 %v1014_v51 }
 0x1a6   : > { %1155 = vmatprep.subr.mxu1 %v1013_v63 }
 0x1a7   : > { %1156 = vmatpush2.msra.mxu1 %v1012_v57 }
 0x1a8   : > { %1157 = vmatprep.subr.mxu1 %v1011_v53 }
 0x1a9   : > { %1158 = vmatpush2.msra.mxu1 %v1010_v35 }
 0x1aa   : > { %1159 = vmatprep.subr.mxu1 %v1009_v50 }
 0x1ab   : > { %1160 = vmatpush2.msra.mxu1 %v1008_v46 }
 0x1ac   : > { %1161 = vmatprep.subr.mxu1 %v1007_v15 }
 0x1ad   : > { %1162 = vmatpush2.msra.mxu1 %v1006_v37 }
 0x1ae   : > { %1163 = vmatprep.subr.mxu1 %v1005_v44 }
 0x1af   : > { %1164 = vmatpush2.msra.mxu1 %v1004_v18 }
 0x1b0   : > { %1165 = vmatprep.subr.mxu1 %v1003_v5 }
 0x1b1   : > { %1166 = vmatpush2.msra.mxu1 %v1002_v3 }
 0x1b2   : > { %1167 = vmatprep.subr.mxu1 %v1001_v10 }
 0x1b3   : > { %1168 = vmatpush2.msra.mxu1 %v1000_v6 }
 0x1b4   : > { %1169 = vmatprep.subr.mxu1 %v999_v9 }
 0x1b5   : > { %1170 = vmatpush2.msra.mxu1 %v998_v16 }
 0x1b6   : > { %1172 = vmatmul.mubr.f32.vlgmr.msra.gmra.mxu1 %v1024_v26 }
 0x23e   : > { %v1102_v23 = vpop.f32.mrf.mxu1 }
 0x23f   : > { %v1103_v61 = vadd.f32 %v1102_v23, %v1030_v31 }
 0x240   : > { %v1104_v25 = vpop.f32.mrf.mxu1 }
 0x241   : > { %v1105_v54 = vadd.f32 %v1104_v25, %v1030_v31 }
 0x276   : > { %v1173_v1 = vpop.f32.mrf.mxu1 }
 0x277   : > { %v1174_v47 = vadd.f32 %v1173_v1, %v1103_v61 }
 0x278   : > { %v1175_v42 = vpop.f32.mrf.mxu1 }
 0x279   : > { %1178 = vst [vmem:[%s215_s13] sm:$0xff] %v1174_v47  ;;  %v1176_v19 = vadd.f32 %v1175_v42, %v1105_v54 }
 0x27b   : > { %1179 = vst [vmem:[%s215_s13 + $0x8] sm:$0xff] %v1176_v19 }
 0x27c   : > { %1424 = shalt.err (!%p1421_p5)
}
 0x27d   : > { %s1425_s6 = scalar_lea.hbm %s1195_s24, 256  ;;  %s1429_s9 = scalar_lea.hbm %s2181_s4, 512 }
 0x27e   : > { %p1426_p6 = scmp.ne.s32.totalorder %s1195_s24, %s1425_s6  ;;  %p1430_p10 = scmp.lt.s32.totalorder %s1195_s24, %s2181_s4 }
 0x27f   : > { %p1431_p11 = scmp.lt.s32.totalorder %s1429_s9, %s1425_s6 }
 0x280   : > { %p1427_p7 = pnand %p1426_p6, %p1557_p4 }
 0x281   : > { %p1432_p12 = por %p1431_p11, %p1430_p10 }
 0x282   : > { %p1428_p9 = pneg %p1427_p7 }
 0x284   : > { %p1433_p13 = pnand %p1432_p12, %p1428_p9 }
 0x286   : > { %1436 = shalt.err (!%p1433_p13)
}
 0x287   : > { %1353 = dma.vmem_to_hbm [thread:$0]  (%p1557_p4), %s1198_s14, 256, %s1195_s24, %s1181_s26  }
 0x288 PF: > { %p1359_p0 = scmp.ge.s32.totalorder %s1487_s20, 2  ;;  %s1209_s12 = sand.u32 1, %s1467_s15  }
 0x289   : > { %s1210_s13 = scalar_lea.sflag [#allocation3], %s1209_s12 }
 0x28a   : > { %p1356_p1 = pnand %p1359_p0, %p1564_p8 }
 0x28c   : > { %p1357_p2 = pneg %p1356_p1 }
 0x28e   : > { %1462 = dma.done.wait (%p1357_p2), %s1210_s13, 256  }
 0x28f   : > { %1464 = vsyncadd (%p1357_p2), %s1210_s13, 4294967040  ;;  %s17_s20 = sadd.s32 1, %s1487_s20   ;;  %s2198_s15 = smov %s1471_s16 }
 0x290   : > { %p14_p3 = scmp.ge.s32.totalorder %s17_s20, 4   ;;  %s2199_s16 = smov %s1475_s17 }
 0x291   : > { %s2200_s17 = smov %s1570_s28  ;;  %s2201_s18 = smov %s1483_s19 }
 0x292   : > { %s2202_s19 = smov %s2204_s23  ;;  %16 = sbr.rel (!%p14_p3) target bundleno = 4 (0x4), region = 71 }
 0x297   :  { %1215 = vsyncpa [#allocation3], 1 }
 0x298   :  { %1217 = vsyncpa [#allocation3 + $0x1], 1 }

</bundles_post_ra>
